<compile_context>
chip_gen: v5e
topology: v5e:2x2
jax: 0.10.0
libtpu: 0.0.40
codegen_flags: <defaults>
</compile_context>

<pallas_src>
import jax
import jax.numpy as jnp
from jax.experimental import pallas as pl
from jax.experimental.pallas import tpu as pltpu


def _mask_predictor_kernel(x_ref, w1_ref, b1_ref, w2_ref, b2_ref, out_ref):
    # x_ref:  (tm, Cin)              flattened input pixels (compute dtype)
    # w1_ref: (Cin, 4*Cmid)          fused deconv weights, taps packed on N axis
    # b1_ref: (1, 4*Cmid)            f32 deconv bias (tiled per tap)
    # w2_ref: (4*Cmid, 4*Ccls)       block-diagonal 1x1-conv weights
    # b2_ref: (1, 4*Ccls)            f32 1x1-conv bias (tiled per tap)
    # out_ref:(tm, 4*Ccls)           logits in compute dtype, taps on lane axis
    x = x_ref[...]
    # One MXU matmul covering all 4 deconv taps; f32 accumulation.
    h = jnp.dot(x, w1_ref[...], preferred_element_type=jnp.float32)
    h = jnp.maximum(h + b1_ref[...], 0.0)          # bias + ReLU in f32
    h = h.astype(w2_ref.dtype)                      # back to compute dtype for MXU
    # One block-diagonal matmul applies the 1x1 conv to all 4 taps at once.
    z = jnp.dot(h, w2_ref[...], preferred_element_type=jnp.float32)
    out_ref[...] = (z + b2_ref[...]).astype(out_ref.dtype)


def _round_up(a, b):
    return (a + b - 1) // b * b


def mask_rcnn_c4_predictor(x_nchw, w_deconv, b_deconv, w_1x1, b_1x1, *,
                           tm=8192,
                           compute_dtype=jnp.bfloat16,
                           vmem_budget_bytes=24 * 1024 * 1024):
    """Forward pass equivalent to the PyTorch MaskRCNNC4Predictor.

    x_nchw:   (N, Cin, H, W)        float32
    w_deconv: (Cin, Cmid, 2, 2)     ConvTranspose2d weight (PyTorch layout)
    b_deconv: (Cmid,)
    w_1x1:    (Ccls, Cmid, 1, 1)    Conv2d weight (PyTorch layout)
    b_1x1:    (Ccls,)
    returns:  (N, Ccls, 2H, 2W)     float32 (NCHW)
    """
    N, Cin, H, W = x_nchw.shape
    Cin_w, Cmid, kH, kW = w_deconv.shape
    assert (kH, kW) == (2, 2) and Cin_w == Cin
    Ccls = w_1x1.shape[0]
    M = N * H * W
    C1 = 4 * Cmid                       # fused deconv width (taps on lanes)
    Cout = 4 * Ccls                     # packed logits width (taps on lanes)

    # ---- corrected VMEM accounting (counts 128-lane padding everywhere) ----
    LANE, SUB = 128, 8
    ein = jnp.dtype(compute_dtype).itemsize
    Cin_l = _round_up(Cin, LANE)
    C1_l = _round_up(C1, LANE)
    Cout_l = _round_up(Cout, LANE)

    # Constant-index weight/bias specs are still double-buffered by BlockSpec.
    w_alloc = (2 * (_round_up(Cin, SUB) * C1_l + _round_up(C1, SUB) * Cout_l) * ein
               + 2 * SUB * (C1_l + Cout_l) * 4)
    # Per-row bytes: double-buffered x + out blocks (lane padded) plus the
    # in-kernel intermediates (x value, h in f32 and compute dtype, z in f32).
    interm_row = Cin_l * ein + C1_l * 4 + C1_l * ein + Cout_l * 4
    row_bytes = 2 * (Cin_l + Cout_l) * ein + interm_row

    # ---- tile-size selection (only shrinks; padding decoupled from tm) ----
    M_pad = _round_up(M, SUB)                       # sublane-granularity padding only
    tm_budget = max(SUB, (vmem_budget_bytes - w_alloc) // row_bytes) // SUB * SUB
    tm = min(max(SUB, int(tm)), tm_budget)
    # Keep >= ~4 parallel grid steps when there is enough work so the single
    # "parallel" axis shards across both v7x TensorCores (no-op on v5e/v6e).
    MIN_TILE = 1024
    if M_pad >= 2 * MIN_TILE:
        tm = min(tm, max(MIN_TILE, _round_up(pl.cdiv(M_pad, 4), 512)))
    tm = max(SUB, (min(tm, M_pad) // SUB) * SUB)
    grid = (pl.cdiv(M_pad, tm),)                    # last block may be partial

    need = w_alloc + tm * row_bytes
    vmem_limit = int(min(need + (8 << 20), vmem_budget_bytes + (8 << 20)))

    # ---- operand preparation (one fused XLA pass per tensor) ----
    # NCHW -> NHWC -> (M, Cin) and the bf16 cast fuse into a single copy
    # (read f32, write compute dtype); rows padded to the sublane multiple.
    x_flat = jnp.transpose(x_nchw, (0, 2, 3, 1)).reshape(M, Cin).astype(compute_dtype)
    if M_pad != M:
        x_flat = jnp.pad(x_flat, ((0, M_pad - M), (0, 0)))

    # (Cin, Cmid, 2, 2) -> (Cin, 4*Cmid); fused column = (kh*2 + kw)*Cmid + m
    w1_fused = jnp.transpose(w_deconv, (0, 2, 3, 1)).reshape(Cin, C1).astype(compute_dtype)
    # (Ccls, Cmid, 1, 1) -> (Cmid, Ccls) -> block-diag (4*Cmid, 4*Ccls)
    w2_m = jnp.transpose(w_1x1.reshape(Ccls, Cmid), (1, 0))
    w2_bd = jnp.kron(jnp.eye(4, dtype=w2_m.dtype), w2_m).astype(compute_dtype)
    # Biases tiled per tap, kept in f32 for the epilogue.
    b1_r = jnp.tile(b_deconv, 4).reshape(1, C1).astype(jnp.float32)
    b2_r = jnp.tile(b_1x1, 4).reshape(1, Cout).astype(jnp.float32)

    # ---- cost estimate (helps XLA schedule the surrounding permutations) ----
    flops = 2 * M_pad * Cin * C1 + 2 * M_pad * C1 * Cout
    bytes_accessed = (M_pad * Cin * ein + Cin * C1 * ein + C1 * Cout * ein
                      + (C1 + Cout) * 4 + M_pad * Cout * ein)
    cost = pl.CostEstimate(flops=flops, transcendentals=0,
                           bytes_accessed=bytes_accessed)

    out_packed = pl.pallas_call(
        _mask_predictor_kernel,
        out_shape=jax.ShapeDtypeStruct((M_pad, Cout), compute_dtype),
        grid_spec=pltpu.PrefetchScalarGridSpec(
            num_scalar_prefetch=0,
            grid=grid,
            in_specs=[
                pl.BlockSpec((tm, Cin), lambda i: (i, 0)),
                pl.BlockSpec((Cin, C1), lambda i: (0, 0)),
                pl.BlockSpec((1, C1), lambda i: (0, 0)),
                pl.BlockSpec((C1, Cout), lambda i: (0, 0)),
                pl.BlockSpec((1, Cout), lambda i: (0, 0)),
            ],
            out_specs=pl.BlockSpec((tm, Cout), lambda i: (i, 0)),
        ),
        compiler_params=pltpu.CompilerParams(
            dimension_semantics=("parallel",),
            vmem_limit_bytes=vmem_limit,
        ),
        cost_estimate=cost,
    )(x_flat, w1_fused, b1_r, w2_bd, b2_r)

    # ---- tap scatter + NCHW + f32 cast in ONE fused permutation ----
    # out_packed[p, (kh*2+kw)*Ccls + c], with p = (n*H + i)*W + j
    out = out_packed[:M].reshape(N, H, W, 2, 2, Ccls)   # (n, i, j, kh, kw, c)
    out = jnp.transpose(out, (0, 5, 1, 3, 2, 4))        # (n, c, i, kh, j, kw)
    return out.reshape(N, Ccls, 2 * H, 2 * W).astype(jnp.float32)   # NCHW


def _reference(x, w_deconv, b_deconv, w_1x1, b_1x1):
    """Plain-JAX f32 reference of the PyTorch forward (NCHW)."""
    N, Cin, H, W = x.shape
    Cmid = w_deconv.shape[1]
    Ccls = w_1x1.shape[0]
    # ConvTranspose2d(k=2,s=2,p=0): y[n,d,2i+kh,2j+kw] = sum_ci x[n,ci,i,j]*w[ci,d,kh,kw]
    t = jnp.einsum('ncij,cdkl->ndikjl', x, w_deconv)     # (n, d, i, kh, j, kw)
    y = t.reshape(N, Cmid, 2 * H, 2 * W) + b_deconv[None, :, None, None]
    y = jnp.maximum(y, 0.0)
    logits = jnp.einsum('ndhw,ed->nehw', y, w_1x1.reshape(Ccls, Cmid))
    return logits + b_1x1[None, :, None, None]


if __name__ == "__main__":
    # Small synthetic config:
    #   MLP_HEAD_DIM (num_inputs) = 32, CONV_LAYERS[-1] (dim_reduced) = 32,
    #   NUM_CLASSES = 8, input ROI feature map 2 x 32 x 8 x 8.
    N, Cin, H, W = 2, 32, 8, 8
    Cmid, Ccls = 32, 8

    key = jax.random.PRNGKey(0)
    kx, kw1, kw2 = jax.random.split(key, 3)

    x = jax.random.normal(kx, (N, Cin, H, W), dtype=jnp.float32)

    # kaiming_normal_(mode='fan_out', nonlinearity='relu'), biases = 0
    std1 = (2.0 / (Cin * 2 * 2)) ** 0.5
    w_deconv = std1 * jax.random.normal(kw1, (Cin, Cmid, 2, 2), dtype=jnp.float32)
    b_deconv = jnp.zeros((Cmid,), dtype=jnp.float32)
    std2 = (2.0 / Ccls) ** 0.5
    w_1x1 = std2 * jax.random.normal(kw2, (Ccls, Cmid, 1, 1), dtype=jnp.float32)
    b_1x1 = jnp.zeros((Ccls,), dtype=jnp.float32)

    ref = _reference(x, w_deconv, b_deconv, w_1x1, b_1x1)
    scale = float(jnp.max(jnp.abs(ref)))

    run_f32 = jax.jit(lambda *a: mask_rcnn_c4_predictor(*a, compute_dtype=jnp.float32))
    run_bf16 = jax.jit(lambda *a: mask_rcnn_c4_predictor(*a))

    # 1) f32 compute path: structural / semantics check of the tap packing,
    #    block-diagonal 1x1 fusion and final permutation.  (Tolerance allows
    #    for the TPU's default MXU precision on f32 operands.)
    out_f32 = jax.block_until_ready(run_f32(x, w_deconv, b_deconv, w_1x1, b_1x1))
    assert out_f32.shape == (N, Ccls, 2 * H, 2 * W), out_f32.shape
    err_f32 = float(jnp.max(jnp.abs(out_f32 - ref)))
    assert err_f32 <= 0.03 * scale + 1e-3, (err_f32, scale)

    # 2) production path: bf16 inputs/weights/output with f32 accumulation.
    out_bf16 = jax.block_until_ready(run_bf16(x, w_deconv, b_deconv, w_1x1, b_1x1))
    assert out_bf16.shape == (N, Ccls, 2 * H, 2 * W), out_bf16.shape
    assert out_bf16.dtype == jnp.float32
    err_bf16 = float(jnp.max(jnp.abs(out_bf16 - ref)))
    # bf16 rounding of inputs/weights/output bounds the error (f32 accumulation).
    assert err_bf16 <= 0.05 * scale + 1e-3, (err_bf16, scale)

    print("KERNEL_OK")
</pallas_src>

<mosaic_0001>
module attributes {stable_mosaic.version = 11 : i64} {
  func.func @_mask_predictor_kernel(%arg0: i32, %arg1: memref<128x32xf32, #tpu.memory_space<vmem>>, %arg2: memref<32x128xf32, #tpu.memory_space<vmem>>, %arg3: memref<1x128xf32, #tpu.memory_space<vmem>>, %arg4: memref<128x32xf32, #tpu.memory_space<vmem>>, %arg5: memref<1x32xf32, #tpu.memory_space<vmem>>, %arg6: memref<128x32xf32, #tpu.memory_space<vmem>>) attributes {dimension_semantics = [#tpu.dimension_semantics<parallel>], iteration_bounds = array<i64: 1>, scalar_prefetch = 0 : i64, scratch_operands = 0 : i64, tpu.core_type = #tpu.core_type<tc>, window_params = [{transform_indices = @transform_0, window_bounds = array<i64: 128, 32>}, {pipeline_mode = #tpu.pipeline_mode<synchronous>, transform_indices = @transform_1, window_bounds = array<i64: 32, 128>}, {pipeline_mode = #tpu.pipeline_mode<synchronous>, transform_indices = @transform_2, window_bounds = array<i64: 1, 128>}, {pipeline_mode = #tpu.pipeline_mode<synchronous>, transform_indices = @transform_3, window_bounds = array<i64: 128, 32>}, {pipeline_mode = #tpu.pipeline_mode<synchronous>, transform_indices = @transform_4, window_bounds = array<i64: 1, 32>}, {transform_indices = @transform_5, window_bounds = array<i64: 128, 32>}]} {
    %c0 = arith.constant 0 : index
    %c0_0 = arith.constant 0 : index
    %0 = vector.load %arg1[%c0, %c0_0] : memref<128x32xf32, #tpu.memory_space<vmem>>, vector<128x32xf32>
    %c0_1 = arith.constant 0 : index
    %c0_2 = arith.constant 0 : index
    %1 = vector.load %arg2[%c0_1, %c0_2] : memref<32x128xf32, #tpu.memory_space<vmem>>, vector<32x128xf32>
    %cst = arith.constant dense<0.000000e+00> : vector<128x128xf32>
    %2 = tpu.matmul %0, %1, %cst {dimension_numbers = #tpu.dot_dimension_numbers<[1], [0], [0], [1], [0, 0, 1, 1], [], []>} : vector<128x32xf32>, vector<32x128xf32>, vector<128x128xf32> -> vector<128x128xf32>
    %c0_3 = arith.constant 0 : index
    %c0_4 = arith.constant 0 : index
    %3 = vector.load %arg3[%c0_3, %c0_4] : memref<1x128xf32, #tpu.memory_space<vmem>>, vector<1x128xf32>
    %4 = vector.broadcast %3 : vector<1x128xf32> to vector<128x128xf32>
    %5 = arith.addf %2, %4 : vector<128x128xf32>
    %cst_5 = arith.constant 0.000000e+00 : f32
    %6 = vector.broadcast %cst_5 : f32 to vector<128x128xf32>
    %7 = arith.maximumf %5, %6 : vector<128x128xf32>
    %c0_6 = arith.constant 0 : index
    %c0_7 = arith.constant 0 : index
    %8 = vector.load %arg4[%c0_6, %c0_7] : memref<128x32xf32, #tpu.memory_space<vmem>>, vector<128x32xf32>
    %cst_8 = arith.constant dense<0.000000e+00> : vector<128x32xf32>
    %9 = tpu.matmul %7, %8, %cst_8 {dimension_numbers = #tpu.dot_dimension_numbers<[1], [0], [0], [1], [0, 0, 1, 1], [], []>} : vector<128x128xf32>, vector<128x32xf32>, vector<128x32xf32> -> vector<128x32xf32>
    %c0_9 = arith.constant 0 : index
    %c0_10 = arith.constant 0 : index
    %10 = vector.load %arg5[%c0_9, %c0_10] : memref<1x32xf32, #tpu.memory_space<vmem>>, vector<1x32xf32>
    %11 = vector.broadcast %10 : vector<1x32xf32> to vector<128x32xf32>
    %12 = arith.addf %9, %11 : vector<128x32xf32>
    %c0_11 = arith.constant 0 : index
    %c0_12 = arith.constant 0 : index
    %13 = vector.load %arg6[%c0_11, %c0_12] : memref<128x32xf32, #tpu.memory_space<vmem>>, vector<128x32xf32>
    tpu.vector_store %arg6[%c0_11, %c0_12], %12 {strides = array<i32>} : memref<128x32xf32, #tpu.memory_space<vmem>>, vector<128x32xf32>,
    return
  }
  func.func @transform_0(%arg0: i32) -> (i32, i32) {
    %c0_i32 = arith.constant 0 : i32
    %c0_i32_0 = arith.constant 0 : i32
    return %arg0, %c0_i32 : i32, i32
  }
  func.func @transform_1(%arg0: i32) -> (i32, i32) {
    %c0_i32 = arith.constant 0 : i32
    %c0_i32_0 = arith.constant 0 : i32
    %c0_i32_1 = arith.constant 0 : i32
    return %c0_i32, %c0_i32_0 : i32, i32
  }
  func.func @transform_2(%arg0: i32) -> (i32, i32) {
    %c0_i32 = arith.constant 0 : i32
    %c0_i32_0 = arith.constant 0 : i32
    %c0_i32_1 = arith.constant 0 : i32
    return %c0_i32, %c0_i32_0 : i32, i32
  }
  func.func @transform_3(%arg0: i32) -> (i32, i32) {
    %c0_i32 = arith.constant 0 : i32
    %c0_i32_0 = arith.constant 0 : i32
    %c0_i32_1 = arith.constant 0 : i32
    return %c0_i32, %c0_i32_0 : i32, i32
  }
  func.func @transform_4(%arg0: i32) -> (i32, i32) {
    %c0_i32 = arith.constant 0 : i32
    %c0_i32_0 = arith.constant 0 : i32
    %c0_i32_1 = arith.constant 0 : i32
    return %c0_i32, %c0_i32_0 : i32, i32
  }
  func.func @transform_5(%arg0: i32) -> (i32, i32) {
    %c0_i32 = arith.constant 0 : i32
    %c0_i32_0 = arith.constant 0 : i32
    return %arg0, %c0_i32 : i32, i32
  }
}

</mosaic_0001>

<bundles_post_ra>
// kernel: tile.19
= control target key start
LH: loop header
LB: loop body
LE: loop exit
PB: predicated region body
PF: predicated region fallthrough
CT: control target
= control target key end

     0   :  { %s37_s8 = smov 8   ;;  %s38_s9 = smov 16   ;;  %vm7_vm0 = vcmask 64512   ;;  %vm13_vm1 = vcmask 261312   ;;  %vm19_vm2 = vcmask 195712   ;;  %vm25_vm3 = vcmask 130112   ;;  %s55_s0 = inlined_call_operand.vmem [shape: f32[4,8], index: 0, kind: input, shape index: {}]   ;;  %s56_s1 = inlined_call_operand.vmem [shape: f32[1,32], index: 1, kind: output, shape index: {}]  }
   0x1   :  { %v4_v0 = vld [vmem:[%s55_s0] sm:$0xf]  ;;  %s36_s0 = smov 24  }
   0x2   :  { %5 = vst [vmem:[#allocation1] sm:$0xf] %v4_v0 }
   0x9   :  { %v10_v1 = vld [vmem:[#allocation1 + $0x3] sm:$0x1]   ;;  %v22_v2 = vld [vmem:[#allocation1 + $0x1] sm:$0x1]   ;;  %v16_v3 = vld [vmem:[#allocation1 + $0x2] sm:$0x1]  }
   0xa   :  { %11 = vrot.lane.b32.xlu0 %v10_v1, %s36_s0  ;;  %23 = vrot.lane.b32.xlu1 %v22_v2, %s37_s8  ;;  %v6_v4 = vld [vmem:[#allocation1] sm:$0x1]  }
   0xb   :  { %8 = vst.msk [vmem:[#allocation0] sm:$0x1] %vm7_vm0, %v6_v4  }
  0x12   :  { %17 = vrot.lane.b32.xlu0 %v16_v3, %s38_s9 }
  0x7c   :  { %v12_v5 = vpop.permute.xlu0 %11   ;;  %v24_v6 = vpop.permute.xlu1 %23  }
  0x7d   :  { %14 = vst.msk [vmem:[#allocation0] sm:$0x1] %vm13_vm1, %v12_v5  }
  0x84   :  { %v18_v7 = vpop.permute.xlu0 %17  }
  0x85   :  { %20 = vst.msk [vmem:[#allocation0] sm:$0x1] %vm19_vm2, %v18_v7  }
  0x86   :  { %26 = vst.msk [vmem:[#allocation0] sm:$0x1] %vm25_vm3, %v24_v6  }
  0x8d   :  { %v29_v8 = vld [vmem:[#allocation0] sm:$0x1] }
  0x8e   :  { %32 = vst [vmem:[%s56_s1] sm:$0x1] %v29_v8 }

// kernel: tile.14
= control target key start
LH: loop header
LB: loop body
LE: loop exit
PB: predicated region body
PF: predicated region fallthrough
CT: control target
= control target key end

     0   :  { %s37_s8 = smov 32   ;;  %s38_s9 = smov 64   ;;  %vm7_vm0 = vcmask 261120   ;;  %vm13_vm1 = vcmask 1048320   ;;  %vm19_vm2 = vcmask 785920   ;;  %vm25_vm3 = vcmask 523520   ;;  %s55_s0 = inlined_call_operand.vmem [shape: f32[4,32], index: 0, kind: input, shape index: {}]   ;;  %s56_s1 = inlined_call_operand.vmem [shape: f32[1,128], index: 1, kind: output, shape index: {}]  }
   0x1   :  { %v4_v0 = vld [vmem:[%s55_s0] sm:$0xf]  ;;  %s36_s0 = smov 96  }
   0x2   :  { %5 = vst [vmem:[#allocation1] sm:$0xf] %v4_v0 }
   0x9   :  { %v10_v1 = vld [vmem:[#allocation1 + $0x3] sm:$0x1]   ;;  %v22_v2 = vld [vmem:[#allocation1 + $0x1] sm:$0x1]   ;;  %v16_v3 = vld [vmem:[#allocation1 + $0x2] sm:$0x1]  }
   0xa   :  { %11 = vrot.lane.b32.xlu0 %v10_v1, %s36_s0  ;;  %23 = vrot.lane.b32.xlu1 %v22_v2, %s37_s8  ;;  %v6_v4 = vld [vmem:[#allocation1] sm:$0x1]  }
   0xb   :  { %8 = vst.msk [vmem:[#allocation0] sm:$0x1] %vm7_vm0, %v6_v4  }
  0x12   :  { %17 = vrot.lane.b32.xlu0 %v16_v3, %s38_s9 }
  0x7c   :  { %v12_v5 = vpop.permute.xlu0 %11   ;;  %v24_v6 = vpop.permute.xlu1 %23  }
  0x7d   :  { %14 = vst.msk [vmem:[#allocation0] sm:$0x1] %vm13_vm1, %v12_v5  }
  0x84   :  { %v18_v7 = vpop.permute.xlu0 %17  }
  0x85   :  { %20 = vst.msk [vmem:[#allocation0] sm:$0x1] %vm19_vm2, %v18_v7  }
  0x86   :  { %26 = vst.msk [vmem:[#allocation0] sm:$0x1] %vm25_vm3, %v24_v6  }
  0x8d   :  { %v29_v8 = vld [vmem:[#allocation0] sm:$0x1] }
  0x8e   :  { %32 = vst [vmem:[%s56_s1] sm:$0x1] %v29_v8 }

// kernel: tile.18
= control target key start
LH: loop header
LB: loop body
LE: loop exit
PB: predicated region body
PF: predicated region fallthrough
CT: control target
= control target key end

     0   :  { %s22_s0 = inlined_call_operand.vmem [shape: f32[8], index: 0, kind: input, shape index: {}]   ;;  %s23_s1 = inlined_call_operand.vmem [shape: f32[4,8], index: 1, kind: output, shape index: {}]  }
   0x1   :  { %v4_v0 = vld [vmem:[%s22_s0] ss:$0 sm:$0xff] }
   0x2   :  { %5 = vst [vmem:[%s23_s1] sm:$0xf] %v4_v0 }

// kernel: tile.13
= control target key start
LH: loop header
LB: loop body
LE: loop exit
PB: predicated region body
PF: predicated region fallthrough
CT: control target
= control target key end

     0   :  { %s22_s0 = inlined_call_operand.vmem [shape: f32[32], index: 0, kind: input, shape index: {}]   ;;  %s23_s1 = inlined_call_operand.vmem [shape: f32[4,32], index: 1, kind: output, shape index: {}]  }
   0x1   :  { %v4_v0 = vld [vmem:[%s22_s0] ss:$0 sm:$0xff] }
   0x2   :  { %5 = vst [vmem:[%s23_s1] sm:$0xf] %v4_v0 }

// kernel: _lambda_.1
= control target key start
LH: loop header
LB: loop body
LE: loop exit
PB: predicated region body
PF: predicated region fallthrough
CT: control target
= control target key end

     0   :  { %vm44_vm0 = vcmask 261120   ;;  %s557_s1 = inlined_call_operand.vmem [shape: f32[32,128], index: 1, kind: input, shape index: {}]   ;;  %s558_s0 = inlined_call_operand.vmem [shape: f32[128,32], index: 0, kind: input, shape index: {}]   ;;  %s559_s2 = inlined_call_operand.vmem [shape: f32[1,128], index: 2, kind: input, shape index: {}]   ;;  %s560_s3 = inlined_call_operand.vmem [shape: f32[128,32], index: 3, kind: input, shape index: {}]   ;;  %s561_s4 = inlined_call_operand.vmem [shape: f32[1,32], index: 4, kind: input, shape index: {}]   ;;  %s562_s5 = inlined_call_operand.vmem [shape: f32[128,32], index: 5, kind: output, shape index: {}]  }
   0x1   :  { %v39_v0 = vld [vmem:[%s557_s1 + $0x18] sm:$0xff]  ;;  %v38_v1 = vld [vmem:[%s557_s1 + $0x10] sm:$0xff]  ;;  %v37_v2 = vld [vmem:[%s557_s1 + $0x8] sm:$0xff] }
   0x2   :  { %105 = vmatpush.msra.mxu0 %v39_v0  ;;  %295 = vmatpush.msra.mxu3 %v39_v0  ;;  %v36_v3 = vld [vmem:[%s557_s1] sm:$0xff]  ;;  %v21_v5 = vld [vmem:[%s558_s0 + $0x8] sm:$0xff]  ;;  %v22_v6 = vld [vmem:[%s558_s0 + $0x10] sm:$0xff] }
   0x3   :  { %v20_v4 = vld [vmem:[%s558_s0] sm:$0xff]  ;;  %v23_v7 = vld [vmem:[%s558_s0 + $0x18] sm:$0xff]  ;;  %v30_v8 = vld [vmem:[%s558_s0 + $0x50] sm:$0xff] }
   0x4   :  { %106 = vmatpush.msra.mxu0 %v38_v1  ;;  %296 = vmatpush.msra.mxu3 %v38_v1  ;;  %v24_v9 = vld [vmem:[%s558_s0 + $0x20] sm:$0xff]  ;;  %v31_v10 = vld [vmem:[%s558_s0 + $0x58] sm:$0xff]  ;;  %v25_v11 = vld [vmem:[%s558_s0 + $0x28] sm:$0xff] }
   0x5   :  { %v32_v12 = vld [vmem:[%s558_s0 + $0x60] sm:$0xff]  ;;  %v189_v13 = vld [vmem:[%s560_s3 + $0x78] sm:$0xff]  ;;  %v188_v14 = vld [vmem:[%s560_s3 + $0x70] sm:$0xff] }
   0x6   :  { %107 = vmatpush.msra.mxu0 %v37_v2  ;;  %297 = vmatpush.msra.mxu3 %v37_v2  ;;  %v187_v15 = vld [vmem:[%s560_s3 + $0x68] sm:$0xff]  ;;  %v26_v16 = vld [vmem:[%s558_s0 + $0x30] sm:$0xff]  ;;  %v186_v17 = vld [vmem:[%s560_s3 + $0x60] sm:$0xff] }
   0x7   :  { %194 = vmatpush.msra.mxu1 %v189_v13  ;;  %299 = vmatpush.msra.mxu2 %v189_v13  ;;  %v33_v18 = vld [vmem:[%s558_s0 + $0x68] sm:$0xff]  ;;  %v185_v19 = vld [vmem:[%s560_s3 + $0x58] sm:$0xff]  ;;  %v184_v20 = vld [vmem:[%s560_s3 + $0x50] sm:$0xff] }
   0x8   :  { %108 = vmatpush.msra.mxu0 %v36_v3  ;;  %298 = vmatpush.msra.mxu3 %v36_v3  ;;  %v183_v21 = vld [vmem:[%s560_s3 + $0x48] sm:$0xff]  ;;  %v27_v22 = vld [vmem:[%s558_s0 + $0x38] sm:$0xff]  ;;  %v182_v23 = vld [vmem:[%s560_s3 + $0x40] sm:$0xff] }
   0x9   :  { %279 = vmatmul.msk.f32.vlgmr.msra.gmra.mxu0 %vm44_vm0, %v20_v4  ;;  %289 = vmatmul.msk.f32.vlgmr.msra.gmra.mxu3 %vm44_vm0, %v30_v8  ;;  %v34_v24 = vld [vmem:[%s558_s0 + $0x70] sm:$0xff]  ;;  %v181_v25 = vld [vmem:[%s560_s3 + $0x38] sm:$0xff]  ;;  %v179_v27 = vld [vmem:[%s560_s3 + $0x28] sm:$0xff] }
   0xa   :  { %300 = vmatpush.msrb.mxu3 %v189_v13  ;;  %195 = vmatpush.msra.mxu1 %v188_v14  ;;  %v180_v26 = vld [vmem:[%s560_s3 + $0x30] sm:$0xff]  ;;  %v28_v28 = vld [vmem:[%s558_s0 + $0x40] sm:$0xff]  ;;  %v35_v30 = vld [vmem:[%s558_s0 + $0x78] sm:$0xff] }
   0xb   :  { %301 = vmatpush.msra.mxu2 %v188_v14  ;;  %v178_v29 = vld [vmem:[%s560_s3 + $0x20] sm:$0xff]  ;;  %v177_v31 = vld [vmem:[%s560_s3 + $0x18] sm:$0xff]  ;;  %v29_v32 = vld [vmem:[%s558_s0 + $0x48] sm:$0xff] }
   0xc   :  { %302 = vmatpush.msrb.mxu3 %v188_v14  ;;  %196 = vmatpush.msra.mxu1 %v187_v15  ;;  %v176_v33 = vld [vmem:[%s560_s3 + $0x10] sm:$0xff]  ;;  %v175_v34 = vld [vmem:[%s560_s3 + $0x8] sm:$0xff]  ;;  %v174_v35 = vld [vmem:[%s560_s3] sm:$0xff] }
   0xd   :  { %303 = vmatpush.msra.mxu2 %v187_v15  ;;  %v331_v36 = vld [vmem:[%s559_s2] ss:$0 sm:$0xff] }
   0xe   :  { %304 = vmatpush.msrb.mxu3 %v187_v15  ;;  %197 = vmatpush.msra.mxu1 %v186_v17 }
   0xf   :  { %305 = vmatpush.msra.mxu2 %v186_v17 }
  0x10   :  { %198 = vmatpush.msra.mxu1 %v185_v19  ;;  %306 = vmatpush.msrb.mxu3 %v186_v17 }
  0x11   :  { %280 = vmatmul.msk.f32.gmra.mxu0 %vm44_vm0, %v21_v5  ;;  %290 = vmatmul.msk.f32.gmra.mxu3 %vm44_vm0, %v31_v10 }
  0x12   :  { %307 = vmatpush.msra.mxu2 %v185_v19  ;;  %199 = vmatpush.msra.mxu1 %v184_v20 }
  0x13   :  { %308 = vmatpush.msrb.mxu3 %v185_v19 }
  0x14   :  { %309 = vmatpush.msra.mxu2 %v184_v20  ;;  %200 = vmatpush.msra.mxu1 %v183_v21 }
  0x15   :  { %310 = vmatpush.msrb.mxu3 %v184_v20 }
  0x16   :  { %311 = vmatpush.msra.mxu2 %v183_v21  ;;  %201 = vmatpush.msra.mxu1 %v182_v23 }
  0x17   :  { %312 = vmatpush.msrb.mxu3 %v183_v21  ;;  %v332_v21 = vld [vmem:[%s561_s4] ss:$0 sm:$0xff] }
  0x18   :  { %313 = vmatpush.msra.mxu2 %v182_v23  ;;  %202 = vmatpush.msra.mxu1 %v181_v25 }
  0x19   :  { %281 = vmatmul.msk.f32.gmra.mxu0 %vm44_vm0, %v22_v6  ;;  %291 = vmatmul.msk.f32.gmra.mxu3 %vm44_vm0, %v32_v12 }
  0x1a   :  { %315 = vmatpush.msra.mxu2 %v181_v25  ;;  %203 = vmatpush.msra.mxu1 %v180_v26 }
  0x1b   :  { %314 = vmatpush.msrb.mxu3 %v182_v23 }
  0x1c   :  { %317 = vmatpush.msra.mxu2 %v180_v26  ;;  %204 = vmatpush.msra.mxu1 %v179_v27 }
  0x1d   :  { %316 = vmatpush.msrb.mxu3 %v181_v25 }
  0x1e   :  { %319 = vmatpush.msra.mxu2 %v179_v27  ;;  %205 = vmatpush.msra.mxu1 %v178_v29 }
  0x1f   :  { %318 = vmatpush.msrb.mxu3 %v180_v26 }
  0x20   :  { %321 = vmatpush.msra.mxu2 %v178_v29  ;;  %206 = vmatpush.msra.mxu1 %v177_v31 }
  0x21   :  { %282 = vmatmul.msk.f32.gmra.mxu0 %vm44_vm0, %v23_v7  ;;  %292 = vmatmul.msk.f32.gmra.mxu3 %vm44_vm0, %v33_v18 }
  0x22   :  { %323 = vmatpush.msra.mxu2 %v177_v31  ;;  %320 = vmatpush.msrb.mxu3 %v179_v27 }
  0x23   :  { %207 = vmatpush.msra.mxu1 %v176_v33 }
  0x24   :  { %322 = vmatpush.msrb.mxu3 %v178_v29  ;;  %325 = vmatpush.msra.mxu2 %v176_v33 }
  0x25   :  { %208 = vmatpush.msra.mxu1 %v175_v34 }
  0x26   :  { %324 = vmatpush.msrb.mxu3 %v177_v31  ;;  %327 = vmatpush.msra.mxu2 %v175_v34 }
  0x27   :  { %209 = vmatpush.msra.mxu1 %v174_v35 }
  0x28   :  { %326 = vmatpush.msrb.mxu3 %v176_v33  ;;  %329 = vmatpush.msra.mxu2 %v174_v35 }
  0x29   :  { %283 = vmatmul.msk.f32.gmra.mxu0 %vm44_vm0, %v24_v9  ;;  %293 = vmatmul.msk.f32.gmra.mxu3 %vm44_vm0, %v34_v24 }
  0x2a   :  { %328 = vmatpush.msrb.mxu3 %v175_v34 }
  0x2c   :  { %330 = vmatpush.msrb.mxu3 %v174_v35 }
  0x31   :  { %284 = vmatmul.msk.f32.gmra.mxu0 %vm44_vm0, %v25_v11  ;;  %294 = vmatmul.msk.f32.gmra.mxu3 %vm44_vm0, %v35_v30 }
  0x39   :  { %285 = vmatmul.msk.f32.gmra.mxu0 %vm44_vm0, %v26_v16 }
  0x41   :  { %286 = vmatmul.msk.f32.gmra.mxu0 %vm44_vm0, %v27_v22 }
  0x49   :  { %287 = vmatmul.msk.f32.gmra.mxu0 %vm44_vm0, %v28_v28 }
  0x51   :  { %288 = vmatmul.msk.f32.gmra.mxu0 %vm44_vm0, %v29_v32 }
  0x86   :  { %v110_v37 = vpop.f32.mrf.mxu0 }
  0x87   :  { %v111_v38 = vadd.f32 %v331_v36, %v110_v37 }
  0x89   :  { %v158_v39 = vmax.f32 %v111_v38, 0.0 }
  0x8b   :  { %210 = vmatmul.f32.vlgmr.msra.gmra.mxu1 %v158_v39 }
  0x8c   :  { %v140_v50 = vpop.f32.mrf.mxu3 }
  0x8d   :  { %v141_v13 = vadd.f32 %v331_v36, %v140_v50 }
  0x8e   :  { %v113_v40 = vpop.f32.mrf.mxu0 }
  0x8f   :  { %v114_v41 = vadd.f32 %v331_v36, %v113_v40  ;;  %v168_v14 = vmax.f32 %v141_v13, 0.0 }
  0x91   :  { %v159_v42 = vmax.f32 %v114_v41, 0.0 }
  0x93   :  { %213 = vmatmul.f32.gmra.mxu1 %v159_v42 }
  0x94   :  { %v143_v54 = vpop.f32.mrf.mxu3 }
  0x95   :  { %v144_v15 = vadd.f32 %v331_v36, %v143_v54 }
  0x96   :  { %v116_v43 = vpop.f32.mrf.mxu0 }
  0x97   :  { %v117_v44 = vadd.f32 %v331_v36, %v116_v43  ;;  %v169_v16 = vmax.f32 %v144_v15, 0.0 }
  0x99   :  { %v160_v45 = vmax.f32 %v117_v44, 0.0 }
  0x9b   :  { %216 = vmatmul.f32.gmra.mxu1 %v160_v45 }
  0x9c   :  { %v146_v58 = vpop.f32.mrf.mxu3 }
  0x9d   :  { %v147_v17 = vadd.f32 %v331_v36, %v146_v58 }
  0x9e   :  { %v119_v46 = vpop.f32.mrf.mxu0 }
  0x9f   :  { %v120_v47 = vadd.f32 %v331_v36, %v119_v46  ;;  %v170_v18 = vmax.f32 %v147_v17, 0.0 }
  0xa1   :  { %v161_v48 = vmax.f32 %v120_v47, 0.0 }
  0xa3   :  { %219 = vmatmul.f32.gmra.mxu1 %v161_v48 }
  0xa4   :  { %v149_v62 = vpop.f32.mrf.mxu3 }
  0xa5   :  { %v150_v19 = vadd.f32 %v331_v36, %v149_v62 }
  0xa6   :  { %v122_v49 = vpop.f32.mrf.mxu0 }
  0xa7   :  { %v123_v51 = vadd.f32 %v331_v36, %v122_v49  ;;  %v171_v20 = vmax.f32 %v150_v19, 0.0 }
  0xa9   :  { %v162_v52 = vmax.f32 %v123_v51, 0.0 }
  0xab   :  { %222 = vmatmul.f32.gmra.mxu1 %v162_v52 }
  0xac   :  { %v152_v2 = vpop.f32.mrf.mxu3 }
  0xad   :  { %v153_v4 = vadd.f32 %v331_v36, %v152_v2 }
  0xae   :  { %v125_v53 = vpop.f32.mrf.mxu0 }
  0xaf   :  { %v126_v55 = vadd.f32 %v331_v36, %v125_v53  ;;  %v172_v6 = vmax.f32 %v153_v4, 0.0 }
  0xb1   :  { %v163_v56 = vmax.f32 %v126_v55, 0.0  ;;  %252 = vmatmul.f32.vlgmr.msrb.gmra.mxu3 %v172_v6 }
  0xb3   :  { %225 = vmatmul.f32.gmra.mxu1 %v163_v56 }
  0xb4   :  { %v155_v8 = vpop.f32.mrf.mxu3 }
  0xb5   :  { %v156_v10 = vadd.f32 %v331_v36, %v155_v8 }
  0xb6   :  { %v128_v57 = vpop.f32.mrf.mxu0 }
  0xb7   :  { %v129_v59 = vadd.f32 %v331_v36, %v128_v57  ;;  %v173_v12 = vmax.f32 %v156_v10, 0.0 }
  0xb9   :  { %v164_v60 = vmax.f32 %v129_v59, 0.0  ;;  %255 = vmatmul.f32.gmra.mxu3 %v173_v12 }
  0xbb   :  { %228 = vmatmul.f32.gmra.mxu1 %v164_v60 }
  0xbe   :  { %v131_v61 = vpop.f32.mrf.mxu0 }
  0xbf   :  { %v132_v63 = vadd.f32 %v331_v36, %v131_v61 }
  0xc1   :  { %v165_v0 = vmax.f32 %v132_v63, 0.0 }
  0xc3   :  { %231 = vmatmul.f32.vlgmr.msra.gmra.mxu2 %v165_v0 }
  0xc6   :  { %v134_v1 = vpop.f32.mrf.mxu0 }
  0xc7   :  { %v135_v3 = vadd.f32 %v331_v36, %v134_v1 }
  0xc9   :  { %v166_v5 = vmax.f32 %v135_v3, 0.0 }
  0xcb   :  { %234 = vmatmul.f32.gmra.mxu2 %v166_v5 }
  0xce   :  { %v137_v7 = vpop.f32.mrf.mxu0 }
  0xcf   :  { %v138_v9 = vadd.f32 %v331_v36, %v137_v7 }
  0xd1   :  { %v167_v11 = vmax.f32 %v138_v9, 0.0 }
  0xd3   :  { %237 = vmatmul.f32.gmra.mxu2 %v167_v11 }
  0xdb   :  { %240 = vmatmul.f32.gmra.mxu2 %v168_v14 }
  0xe3   :  { %243 = vmatmul.f32.gmra.mxu2 %v169_v16 }
  0xeb   :  { %246 = vmatmul.f32.gmra.mxu2 %v170_v18 }
  0xf3   :  { %249 = vmatmul.f32.gmra.mxu2 %v171_v20 }
 0x108   :  { %v211_v22 = vpop.f32.mrf.mxu1 }
 0x109   :  { %v212_v23 = vadd.f32 %v332_v21, %v211_v22 }
 0x10b   :  { %259 = vst.msk [vmem:[%s562_s5] sm:$0xff] %vm44_vm0, %v212_v23 }
 0x110   :  { %v214_v24 = vpop.f32.mrf.mxu1 }
 0x111   :  { %v215_v25 = vadd.f32 %v332_v21, %v214_v24 }
 0x113   :  { %260 = vst.msk [vmem:[%s562_s5 + $0x8] sm:$0xff] %vm44_vm0, %v215_v25 }
 0x118   :  { %v217_v26 = vpop.f32.mrf.mxu1 }
 0x119   :  { %v218_v27 = vadd.f32 %v332_v21, %v217_v26 }
 0x11b   :  { %261 = vst.msk [vmem:[%s562_s5 + $0x10] sm:$0xff] %vm44_vm0, %v218_v27 }
 0x120   :  { %v220_v28 = vpop.f32.mrf.mxu1 }
 0x121   :  { %v221_v29 = vadd.f32 %v332_v21, %v220_v28 }
 0x123   :  { %262 = vst.msk [vmem:[%s562_s5 + $0x18] sm:$0xff] %vm44_vm0, %v221_v29 }
 0x128   :  { %v223_v30 = vpop.f32.mrf.mxu1 }
 0x129   :  { %v224_v31 = vadd.f32 %v332_v21, %v223_v30 }
 0x12b   :  { %263 = vst.msk [vmem:[%s562_s5 + $0x20] sm:$0xff] %vm44_vm0, %v224_v31 }
 0x130   :  { %v226_v32 = vpop.f32.mrf.mxu1 }
 0x131   :  { %v227_v33 = vadd.f32 %v332_v21, %v226_v32 }
 0x133   :  { %264 = vst.msk [vmem:[%s562_s5 + $0x28] sm:$0xff] %vm44_vm0, %v227_v33 }
 0x134   :  { %v253_v39 = vpop.f32.mrf.mxu3 }
 0x135   :  { %v254_v41 = vadd.f32 %v332_v21, %v253_v39 }
 0x137   :  { %273 = vst.msk [vmem:[%s562_s5 + $0x70] sm:$0xff] %vm44_vm0, %v254_v41 }
 0x138   :  { %v229_v34 = vpop.f32.mrf.mxu1 }
 0x139   :  { %v230_v35 = vadd.f32 %v332_v21, %v229_v34 }
 0x13b   :  { %265 = vst.msk [vmem:[%s562_s5 + $0x30] sm:$0xff] %vm44_vm0, %v230_v35 }
 0x13c   :  { %v256_v43 = vpop.f32.mrf.mxu3 }
 0x13d   :  { %v257_v45 = vadd.f32 %v332_v21, %v256_v43 }
 0x13f   :  { %274 = vst.msk [vmem:[%s562_s5 + $0x78] sm:$0xff] %vm44_vm0, %v257_v45 }
 0x146   :  { %v232_v36 = vpop.f32.mrf.mxu2 }
 0x147   :  { %v233_v37 = vadd.f32 %v332_v21, %v232_v36 }
 0x149   :  { %266 = vst.msk [vmem:[%s562_s5 + $0x38] sm:$0xff] %vm44_vm0, %v233_v37 }
 0x14e   :  { %v235_v38 = vpop.f32.mrf.mxu2 }
 0x14f   :  { %v236_v40 = vadd.f32 %v332_v21, %v235_v38 }
 0x151   :  { %267 = vst.msk [vmem:[%s562_s5 + $0x40] sm:$0xff] %vm44_vm0, %v236_v40 }
 0x156   :  { %v238_v42 = vpop.f32.mrf.mxu2 }
 0x157   :  { %v239_v44 = vadd.f32 %v332_v21, %v238_v42 }
 0x159   :  { %268 = vst.msk [vmem:[%s562_s5 + $0x48] sm:$0xff] %vm44_vm0, %v239_v44 }
 0x15e   :  { %v241_v46 = vpop.f32.mrf.mxu2 }
 0x15f   :  { %v242_v47 = vadd.f32 %v332_v21, %v241_v46 }
 0x161   :  { %269 = vst.msk [vmem:[%s562_s5 + $0x50] sm:$0xff] %vm44_vm0, %v242_v47 }
 0x166   :  { %v244_v48 = vpop.f32.mrf.mxu2 }
 0x167   :  { %v245_v49 = vadd.f32 %v332_v21, %v244_v48 }
 0x169   :  { %270 = vst.msk [vmem:[%s562_s5 + $0x58] sm:$0xff] %vm44_vm0, %v245_v49 }
 0x16e   :  { %v247_v50 = vpop.f32.mrf.mxu2 }
 0x16f   :  { %v248_v51 = vadd.f32 %v332_v21, %v247_v50 }
 0x171   :  { %271 = vst.msk [vmem:[%s562_s5 + $0x60] sm:$0xff] %vm44_vm0, %v248_v51 }
 0x176   :  { %v250_v52 = vpop.f32.mrf.mxu2 }
 0x177   :  { %v251_v53 = vadd.f32 %v332_v21, %v250_v52 }
 0x179   :  { %272 = vst.msk [vmem:[%s562_s5 + $0x68] sm:$0xff] %vm44_vm0, %v251_v53 }

</bundles_post_ra>
